<compile_context>
chip_gen: v7x
topology: tpu7x:2x2x1
jax: 0.10.0
libtpu: 0.0.40
codegen_flags: <defaults>
</compile_context>

<pallas_src>
import jax
import jax.numpy as jnp
from jax.experimental import pallas as pl
from jax.experimental.pallas import tpu as pltpu

STATE_DIM = 4      # CartPole-v1 observation dim
HIDDEN_DIM = 128
ACTION_DIM = 2     # CartPole-v1 action dim
_K_PAD = 8         # fc1 contraction dim padded to one sublane tile (4 feats + bias + 3 zero)

# --- packed parameter layouts (built once, outside the kernel) ---------------
# slab  [8, HIDDEN]  (small-batch VPU kernel):
#   rows 0..3 : W1   [state, hidden]       row 4 : b1
#   row  5    : w2diff = W2[:,1]-W2[:,0]   row 6 : b2diff (all lanes)   row 7 : 0
_ROW_B1, _ROW_W2D, _ROW_B2D = STATE_DIM, STATE_DIM + 1, STATE_DIM + 2
# wbig  [HIDDEN, 8]  (gridded MXU kernel):
#   cols 0..3 : W1^T [hidden, state]       col 4 : b1
#   col  5    : w2diff                     col 6 : b2diff                col 7 : 0
_COL_B1, _COL_W2D, _COL_B2D = STATE_DIM, STATE_DIM + 1, STATE_DIM + 2


def policy_net_kernel_small(x_ref, p_ref, out_ref):
    """Tiny-batch path: batch-major [B,4] block, pure VPU/XLU/EUP (no MXU)."""
    x = x_ref[...]                                       # [B, 4]
    h = p_ref[_ROW_B1:_ROW_B1 + 1, :]                    # b1, [1, H]
    for i in range(STATE_DIM):                           # static unroll (4 FMAs)
        h = h + x[:, i:i + 1] * p_ref[i:i + 1, :]        # [B,1] * [1,H]
    h = jnp.maximum(h, 0.0)                              # [B, H]
    # softmax over 2 actions == sigmoid of the logit difference
    diff = jnp.sum(h * p_ref[_ROW_W2D:_ROW_W2D + 1, :], axis=1, keepdims=True)  # [B,1]
    diff = diff + p_ref[_ROW_B2D:_ROW_B2D + 1, 0:1]
    p1 = jax.nn.sigmoid(diff)                            # EUP
    p0 = jax.nn.sigmoid(-diff)                           # (not 1-p1: keeps rel. accuracy)
    out_ref[...] = jnp.concatenate([p0, p1], axis=1)     # [B, 2]


def policy_net_kernel_big(xT_ref, w_ref, out_ref):
    """Gridded lane-dense path.
    xT_ref : [8, T]  rows 0..3 features, row 4 ones (bias fold), rows 5..7 zero
    w_ref  : [HIDDEN, 8] cols 0..3 W1^T, col 4 b1, col 5 w2diff, col 6 b2diff
    out_ref: [2, T]  row 0 = P(a=0), row 1 = P(a=1)  (full-lane-width row stores)
    """
    w = w_ref[...]                                       # [H, 8]
    # fc1 (+ bias via ones row) on the MXU; zero xT rows 5..7 kill cols 5..7.
    hT = jnp.dot(w, xT_ref[...], preferred_element_type=jnp.float32)   # [H, T]
    hT = jnp.maximum(hT, 0.0)
    # fc2 + 2-way softmax as a single sublane reduction + sigmoid.
    diff = jnp.sum(hT * w[:, _COL_W2D:_COL_W2D + 1], axis=0, keepdims=True)  # [1, T]
    diff = diff + w[0:1, _COL_B2D:_COL_B2D + 1]
    out_ref[0:1, :] = jax.nn.sigmoid(-diff)              # P(action 0)
    out_ref[1:2, :] = jax.nn.sigmoid(diff)               # P(action 1)


def pack_params(w1, b1, w2, b2):
    """w1:[S,H], b1:[H], w2:[H,A], b2:[A] -> (slab [8,H], wbig [H,8]) f32."""
    S, H = w1.shape
    w1 = w1.astype(jnp.float32)
    b1 = b1.astype(jnp.float32)
    w2diff = (w2[:, 1] - w2[:, 0]).astype(jnp.float32)   # precomputed once (free)
    b2diff = (b2[1] - b2[0]).astype(jnp.float32)

    slab = jnp.zeros((_K_PAD, H), jnp.float32)
    slab = slab.at[0:S, :].set(w1)
    slab = slab.at[_ROW_B1, :].set(b1)
    slab = slab.at[_ROW_W2D, :].set(w2diff)
    slab = slab.at[_ROW_B2D, :].set(b2diff)

    wbig = jnp.zeros((H, _K_PAD), jnp.float32)
    wbig = wbig.at[:, 0:S].set(w1.T)
    wbig = wbig.at[:, _COL_B1].set(b1)
    wbig = wbig.at[:, _COL_W2D].set(w2diff)
    wbig = wbig.at[:, _COL_B2D].set(b2diff)
    return slab, wbig


def policy_net_forward(x, params, *, batch_tile=512, small_batch_max=256):
    """x: [B, STATE_DIM] f32 -> probs [B, ACTION_DIM] f32 (matches the torch module)."""
    slab, wbig = params
    x = x.astype(jnp.float32)
    B = x.shape[0]

    if B <= small_batch_max:
        # Dispatch-dominated tiny batch: one block, VPU kernel, no grid.
        return pl.pallas_call(
            policy_net_kernel_small,
            out_shape=jax.ShapeDtypeStruct((B, ACTION_DIM), jnp.float32),
            in_specs=[pl.BlockSpec(memory_space=pltpu.MemorySpace.VMEM)] * 2,
            out_specs=pl.BlockSpec(memory_space=pltpu.MemorySpace.VMEM),
        )(x, slab)

    # Gridded lane-dense path (vectorized envs): batch on the lane axis.
    # Always >= 2 grid steps so "parallel" can shard across v7x's 2 TCs;
    # batch padded to a tile multiple (no unblocked ragged fallback).
    n_tiles = max(2, pl.cdiv(B, batch_tile))
    tile = pl.cdiv(pl.cdiv(B, n_tiles), 128) * 128
    b_pad = n_tiles * tile

    xT = jnp.zeros((_K_PAD, b_pad), jnp.float32)
    xT = xT.at[:STATE_DIM, :B].set(x.T)          # layout plumbing in the wrapper
    xT = xT.at[STATE_DIM, :].set(1.0)            # ones row -> folds b1 into the matmul

    outT = pl.pallas_call(
        policy_net_kernel_big,
        out_shape=jax.ShapeDtypeStruct((ACTION_DIM, b_pad), jnp.float32),
        grid_spec=pltpu.PrefetchScalarGridSpec(
            num_scalar_prefetch=0,
            grid=(n_tiles,),
            in_specs=[
                pl.BlockSpec((_K_PAD, tile), lambda i: (0, i)),          # xT: lane-dense
                pl.BlockSpec((HIDDEN_DIM, _K_PAD), lambda i: (0, 0)),    # weights: constant
            ],
            out_specs=pl.BlockSpec((ACTION_DIM, tile), lambda i: (0, i)),
        ),
        compiler_params=pltpu.CompilerParams(dimension_semantics=("parallel",)),
    )(xT, wbig)
    return outT[:, :B].T                          # back to the [B, 2] module contract


def init_params(key, state_dim, hidden_dim, action_dim):
    """Mimics torch.nn.Linear default init (U[-1/sqrt(fan_in), 1/sqrt(fan_in)]).
    Weights stored transposed vs. PyTorch: [in_features, out_features]."""
    k1, k2, k3, k4 = jax.random.split(key, 4)
    lim1 = 1.0 / jnp.sqrt(jnp.float32(state_dim))
    lim2 = 1.0 / jnp.sqrt(jnp.float32(hidden_dim))
    w1 = jax.random.uniform(k1, (state_dim, hidden_dim), jnp.float32, -lim1, lim1)
    b1 = jax.random.uniform(k2, (hidden_dim,), jnp.float32, -lim1, lim1)
    w2 = jax.random.uniform(k3, (hidden_dim, action_dim), jnp.float32, -lim2, lim2)
    b2 = jax.random.uniform(k4, (action_dim,), jnp.float32, -lim2, lim2)
    return w1, b1, w2, b2


if __name__ == "__main__":
    key = jax.random.PRNGKey(0)
    k_x, k_p, k_xl = jax.random.split(key, 3)

    w1, b1, w2, b2 = init_params(k_p, STATE_DIM, HIDDEN_DIM, ACTION_DIM)
    params = pack_params(w1, b1, w2, b2)

    def ref_forward(xx):
        h = jnp.maximum(xx @ w1 + b1, 0.0)
        return jax.nn.softmax(h @ w2 + b2, axis=1)

    # Tiny batch (per-step REINFORCE policy evaluation) -> single-block VPU kernel.
    x_small = jax.random.normal(k_x, (2, STATE_DIM), dtype=jnp.float32)
    probs_small = jax.block_until_ready(policy_net_forward(x_small, params))
    assert probs_small.shape == (2, ACTION_DIM)
    assert jnp.allclose(probs_small, ref_forward(x_small), atol=1e-5, rtol=1e-5)
    assert jnp.allclose(jnp.sum(probs_small, axis=1), 1.0, atol=1e-5)

    # Ragged batched path (vectorized envs): exercises padding, the 2-step
    # "parallel" grid, the lane-dense transposed layout and the MXU fc1.
    x_big = jax.random.normal(k_xl, (600, STATE_DIM), dtype=jnp.float32)
    probs_big = jax.block_until_ready(policy_net_forward(x_big, params))
    assert probs_big.shape == (600, ACTION_DIM)
    # Loose-ish tolerance only to be robust to a reduced-precision default f32
    # MXU path; any layout/indexing bug would produce O(1) errors.
    assert jnp.allclose(probs_big, ref_forward(x_big), atol=2e-3, rtol=2e-3)
    assert jnp.allclose(jnp.sum(probs_big, axis=1), 1.0, atol=1e-5)

    print("KERNEL_OK")
</pallas_src>

<mosaic_0001>
module attributes {stable_mosaic.version = 11 : i64} {
  func.func @policy_net_kernel_small(%arg0: memref<2x4xf32, #tpu.memory_space<vmem>>, %arg1: memref<8x128xf32, #tpu.memory_space<vmem>>, %arg2: memref<2x2xf32, #tpu.memory_space<vmem>>) attributes {dimension_semantics = [], scalar_prefetch = 0 : i64, scratch_operands = 0 : i64, tpu.core_type = #tpu.core_type<tc>} {
    %c0 = arith.constant 0 : index
    %c0_0 = arith.constant 0 : index
    %0 = vector.load %arg0[%c0, %c0_0] : memref<2x4xf32, #tpu.memory_space<vmem>>, vector<2x4xf32>
    %c4 = arith.constant 4 : index
    %c0_1 = arith.constant 0 : index
    %1 = vector.load %arg1[%c4, %c0_1] : memref<8x128xf32, #tpu.memory_space<vmem>>, vector<1x128xf32>
    %2 = vector.extract_strided_slice %0 {offsets = [0, 0], sizes = [2, 1], strides = [1, 1]} : vector<2x4xf32> to vector<2x1xf32>
    %c0_2 = arith.constant 0 : index
    %c0_3 = arith.constant 0 : index
    %3 = vector.load %arg1[%c0_2, %c0_3] : memref<8x128xf32, #tpu.memory_space<vmem>>, vector<1x128xf32>
    %4 = vector.broadcast %2 : vector<2x1xf32> to vector<2x128xf32>
    %5 = vector.broadcast %3 : vector<1x128xf32> to vector<2x128xf32>
    %6 = arith.mulf %4, %5 : vector<2x128xf32>
    %7 = vector.broadcast %1 : vector<1x128xf32> to vector<2x128xf32>
    %8 = arith.addf %7, %6 : vector<2x128xf32>
    %9 = vector.extract_strided_slice %0 {offsets = [0, 1], sizes = [2, 1], strides = [1, 1]} : vector<2x4xf32> to vector<2x1xf32>
    %c1 = arith.constant 1 : index
    %c0_4 = arith.constant 0 : index
    %10 = vector.load %arg1[%c1, %c0_4] : memref<8x128xf32, #tpu.memory_space<vmem>>, vector<1x128xf32>
    %11 = vector.broadcast %9 : vector<2x1xf32> to vector<2x128xf32>
    %12 = vector.broadcast %10 : vector<1x128xf32> to vector<2x128xf32>
    %13 = arith.mulf %11, %12 : vector<2x128xf32>
    %14 = arith.addf %8, %13 : vector<2x128xf32>
    %15 = vector.extract_strided_slice %0 {offsets = [0, 2], sizes = [2, 1], strides = [1, 1]} : vector<2x4xf32> to vector<2x1xf32>
    %c2 = arith.constant 2 : index
    %c0_5 = arith.constant 0 : index
    %16 = vector.load %arg1[%c2, %c0_5] : memref<8x128xf32, #tpu.memory_space<vmem>>, vector<1x128xf32>
    %17 = vector.broadcast %15 : vector<2x1xf32> to vector<2x128xf32>
    %18 = vector.broadcast %16 : vector<1x128xf32> to vector<2x128xf32>
    %19 = arith.mulf %17, %18 : vector<2x128xf32>
    %20 = arith.addf %14, %19 : vector<2x128xf32>
    %21 = vector.extract_strided_slice %0 {offsets = [0, 3], sizes = [2, 1], strides = [1, 1]} : vector<2x4xf32> to vector<2x1xf32>
    %c3 = arith.constant 3 : index
    %c0_6 = arith.constant 0 : index
    %22 = vector.load %arg1[%c3, %c0_6] : memref<8x128xf32, #tpu.memory_space<vmem>>, vector<1x128xf32>
    %23 = vector.broadcast %21 : vector<2x1xf32> to vector<2x128xf32>
    %24 = vector.broadcast %22 : vector<1x128xf32> to vector<2x128xf32>
    %25 = arith.mulf %23, %24 : vector<2x128xf32>
    %26 = arith.addf %20, %25 : vector<2x128xf32>
    %cst = arith.constant 0.000000e+00 : f32
    %27 = vector.broadcast %cst : f32 to vector<2x128xf32>
    %28 = arith.maximumf %26, %27 : vector<2x128xf32>
    %c5 = arith.constant 5 : index
    %c0_7 = arith.constant 0 : index
    %29 = vector.load %arg1[%c5, %c0_7] : memref<8x128xf32, #tpu.memory_space<vmem>>, vector<1x128xf32>
    %30 = vector.broadcast %29 : vector<1x128xf32> to vector<2x128xf32>
    %31 = arith.mulf %28, %30 : vector<2x128xf32>
    %cst_8 = arith.constant dense<0.000000e+00> : vector<2xf32>
    %32 = vector.multi_reduction <add>, %31, %cst_8 [1] : vector<2x128xf32> to vector<2xf32>
    %33 = vector.shape_cast %32 : vector<2xf32> to vector<2x1xf32>
    %c6 = arith.constant 6 : index
    %c0_9 = arith.constant 0 : index
    %34 = vector.load %arg1[%c6, %c0_9] : memref<8x128xf32, #tpu.memory_space<vmem>>, vector<1x1xf32>
    %35 = vector.broadcast %34 : vector<1x1xf32> to vector<2x1xf32>
    %36 = arith.addf %33, %35 : vector<2x1xf32>
    %37 = arith.negf %36 : vector<2x1xf32>
    %38 = math.exp %37 : vector<2x1xf32>
    %cst_10 = arith.constant 1.000000e+00 : f32
    %39 = vector.broadcast %cst_10 : f32 to vector<2x1xf32>
    %40 = arith.addf %39, %38 : vector<2x1xf32>
    %41 = arith.divf %39, %40 : vector<2x1xf32>
    %cst_11 = arith.constant 0.000000e+00 : f32
    %42 = vector.broadcast %cst_11 : f32 to vector<2x1xf32>
    %43 = arith.subf %42, %36 : vector<2x1xf32>
    %44 = arith.negf %43 : vector<2x1xf32>
    %45 = math.exp %44 : vector<2x1xf32>
    %cst_12 = arith.constant 1.000000e+00 : f32
    %46 = vector.broadcast %cst_12 : f32 to vector<2x1xf32>
    %47 = arith.addf %46, %45 : vector<2x1xf32>
    %48 = arith.divf %46, %47 : vector<2x1xf32>
    %49 = tpu.concatenate %48, %41 in 1 : vector<2x1xf32>, vector<2x1xf32> -> vector<2x2xf32>
    %c0_13 = arith.constant 0 : index
    %c0_14 = arith.constant 0 : index
    %50 = vector.load %arg2[%c0_13, %c0_14] : memref<2x2xf32, #tpu.memory_space<vmem>>, vector<2x2xf32>
    tpu.vector_store %arg2[%c0_13, %c0_14], %49 {strides = array<i32>} : memref<2x2xf32, #tpu.memory_space<vmem>>, vector<2x2xf32>,
    return
  }
}

</mosaic_0001>

<bundles_post_ra>
// kernel: tpu_custom_call.1
= control target key start
LH: loop header
LB: loop body
LE: loop exit
PB: predicated region body
PF: predicated region fallthrough
CT: control target
= control target key end

     0   :  { %7 = vsyncpa [#allocation3], 0  ;;  %s302_s0 = inlined_call_operand.hbm [shape: f32[2,4], index: 0, kind: input, shape index: {}]   ;;  %s303_s1 = inlined_call_operand.hbm [shape: f32[8,128], index: 1, kind: input, shape index: {}]   ;;  %s304_s2 = inlined_call_operand.hbm [shape: f32[2,2], index: 2, kind: output, shape index: {}]  }
   0x1   :  { %8 = vsyncpa [#allocation6], 0 }
   0x2   :  { %9 = vsyncpa [#allocation4], 0  ;;  %s243_s9 = smov [#allocation2]   ;;  %s244_s11 = smov [#allocation5]  }
   0x3   :  { %s16_s10 = sshll.u32 %s243_s9, 4  ;;  %s26_s12 = sshll.u32 %s244_s11, 4  ;;  %s17_s10 = int_to_ptr.vmem [resolvable:$true] %s16_s10  ;;  %s27_s12 = int_to_ptr.vmem [resolvable:$true] %s26_s12 }
   0x4   :  { %s171_s15 = scalar_lea.hbm %s302_s0, 32 }
   0x5   :  { %p172_p0 = scmp.ne.s32.totalorder %s302_s0, %s171_s15  ;;  %p175_p1 = scmp.lt.u32.totalorder %s171_s15, %s302_s0 }
   0x7   :  { %p177_p2 = pnand %p175_p1, %p172_p0 }
   0x9   :  { %180 = shalt.err (!%p177_p2)
}
   0xa   :  { %s181_s20 = scalar_lea.vmem %s17_s10, 32  ;;  %p186_p4 = scmp.lt.s32.totalorder %s17_s10, %s17_s10 }
   0xb   :  { %p182_p3 = scmp.ne.s32.totalorder %s17_s10, %s181_s20  ;;  %p187_p5 = scmp.lt.s32.totalorder %s181_s20, %s181_s20 }
   0xd   :  { %p188_p6 = por %p187_p5, %p186_p4 }
   0xf   :  { %p189_p7 = pnand %p188_p6, %p182_p3 }
  0x11   :  { %192 = shalt.err (!%p189_p7)
}
  0x12   :  { %19 = dma.hbm_to_vmem [thread:$0]  %s302_s0, 32, %s17_s10, [#allocation3]  }
  0x13   :  { %s193_s25 = scalar_lea.hbm %s303_s1, 128 }
  0x14   :  { %p194_p8 = scmp.ne.s32.totalorder %s303_s1, %s193_s25  ;;  %p197_p9 = scmp.lt.u32.totalorder %s193_s25, %s303_s1 }
  0x16   :  { %p199_p10 = pnand %p197_p9, %p194_p8 }
  0x18   :  { %202 = shalt.err (!%p199_p10)
}
  0x19   :  { %s203_s30 = scalar_lea.vmem %s27_s12, 128  ;;  %p208_p12 = scmp.lt.s32.totalorder %s27_s12, %s27_s12 }
  0x1a   :  { %p204_p11 = scmp.ne.s32.totalorder %s27_s12, %s203_s30  ;;  %p209_p13 = scmp.lt.s32.totalorder %s203_s30, %s203_s30 }
  0x1c   :  { %p210_p0 = por %p209_p13, %p208_p12 }
  0x1e   :  { %p211_p1 = pnand %p210_p0, %p204_p11 }
  0x20   :  { %214 = shalt.err (!%p211_p1)
}
  0x21   :  { %29 = dma.hbm_to_vmem [thread:$0]  %s303_s1, 128, %s27_s12, [#allocation6]  }
  0x22   :  { %237 = dma.done.wait [#allocation3], 32  }
  0x23   :  { %238 = vsyncadd [#allocation3], 4294967264 }
  0x24   :  { %239 = dma.done.wait [#allocation6], 128  }
  0x25   :  { %240 = vsyncadd [#allocation6], 4294967168  ;;  %v245_v0 = vmov 0   ;;  %v246_v1 = vmov 2   ;;  %v36_v2 = vld [vmem:[#allocation2] sm:$0x3] }
  0x26   :  { %158 = vset.pattern.permute.xlu0 %v245_v0  ;;  %160 = vset.pattern.permute.xlu1 %v246_v1  ;;  %v247_v3 = vmov 1   ;;  %v248_v4 = vmov 3   ;;  %v141_v5 = vld [vmem:[#allocation5] ss:$0 sm:$0xff]  ;;  %v142_v9 = vld [vmem:[#allocation5 + $0x4] ss:$0 sm:$0xff] }
  0x27   :  { %41 = vperm.xlu0 %158, %v36_v2   ;;  %67 = vperm.xlu1 %160, %v36_v2   ;;  %v143_v10 = vld [vmem:[#allocation5 + $0x1] ss:$0 sm:$0xff]  ;;  %v144_v11 = vld [vmem:[#allocation5 + $0x2] ss:$0 sm:$0xff]  ;;  %v145_v13 = vld [vmem:[#allocation5 + $0x3] ss:$0 sm:$0xff] }
  0x28   :  { %v146_v22 = vld [vmem:[#allocation5 + $0x5] ss:$0 sm:$0xff]  ;;  %vm94_vm0 = vcmask 1041408   ;;  %v147_v26 = vld [vmem:[#allocation5 + $0x6] ss:$0 sm:$0xff]  ;;  %s249_s1 = smov 1  }
  0x29   :  { %s250_s4 = smov [#allocation7]   ;;  %vm121_vm1 = vcmask 7168   ;;  %vm123_vm2 = vcmask 9216  }
  0x2a   :  { %s131_s5 = sshll.u32 %s250_s4, 4  ;;  %s132_s5 = int_to_ptr.vmem [resolvable:$true] %s131_s5 }
  0x2b   :  { %159 = vset.pattern.permute.xlu0 %v247_v3  ;;  %161 = vset.pattern.permute.xlu1 %v248_v4  ;;  %s215_s6 = scalar_lea.vmem %s132_s5, 32  ;;  %p220_p3 = scmp.lt.s32.totalorder %s132_s5, %s132_s5 }
  0x2c   :  { %56 = vperm.xlu0 %159, %v36_v2   ;;  %78 = vperm.xlu1 %161, %v36_v2   ;;  %p216_p2 = scmp.ne.s32.totalorder %s132_s5, %s215_s6  ;;  %p221_p4 = scmp.lt.s32.totalorder %s215_s6, %s215_s6 }
  0x2e   :  { %p222_p5 = por %p221_p4, %p220_p3 }
  0x30   :  { %162 = vset.pattern.permute.xlu0 %v248_v4  ;;  %p223_p6 = pnand %p222_p5, %p216_p2 }
  0xa6   :  { %v42_v6 = vpop.permute.xlu0 %41  ;;  %v68_v7 = vpop.permute.xlu1 %67 }
  0xa7   :  { %v48_v8 = vmul.f32 %v141_v5, %v42_v6  ;;  %v74_v17 = vmul.f32 %v144_v11, %v68_v7 }
  0xa9   :  { %v53_v15 = vadd.f32 %v142_v9, %v48_v8 }
  0xab   :  { %v57_v12 = vpop.permute.xlu0 %56  ;;  %v79_v14 = vpop.permute.xlu1 %78 }
  0xac   :  { %v63_v16 = vmul.f32 %v143_v10, %v57_v12  ;;  %v85_v19 = vmul.f32 %v145_v13, %v79_v14 }
  0xae   :  { %v64_v18 = vadd.f32 %v63_v16, %v53_v15 }
  0xb0   :  { %v75_v20 = vadd.f32 %v74_v17, %v64_v18 }
  0xb2   :  { %v86_v21 = vadd.f32 %v85_v19, %v75_v20 }
  0xb4   :  { %v87_v23 = vmax.f32 %v86_v21, 0.0 }
  0xb6   :  { %v93_v24 = vmul.f32 %v146_v22, %v87_v23 }
  0xb8   :  { %v95_v25 = vsel %vm94_vm0, %v93_v24, 0.0 }
  0xb9   :  { %96 = vadd.xlane.f32.xlu1 %v95_v25 }
 0x146   :  { %v97_v27 = vpop.xlane.xlu1 %96 }
 0x147   :  { %v103_v28 = vadd.f32 %v147_v26, %v97_v27 }
 0x149   :  { %v148_v29 = vmul.f32 -1.442695, %v103_v28  ;;  %v110_v33 = vsub.f32 0.0, %v103_v28 }
 0x14b   :  { %163 = vpow2.f32 %v148_v29  ;;  %v149_v34 = vmul.f32 -1.442695, %v110_v33 }
 0x155   :  { %v164_v30 = vpop.eup %163 }
 0x156   :  { %v107_v31 = vadd.f32 1.0, %v164_v30 }
 0x158   :  { %165 = vrcp.f32 %v107_v31 }
 0x159   :  { %167 = vpow2.f32 %v149_v34 }
 0x162   :  { %v166_v32 = vpop.eup %165 }
 0x163   :  { %118 = vrot.lane.b32.xlu0 %v166_v32, %s249_s1  ;;  %v168_v35 = vpop.eup %167 }
 0x164   :  { %v114_v36 = vadd.f32 1.0, %v168_v35 }
 0x166   :  { %169 = vrcp.f32 %v114_v36 }
 0x170   :  { %v170_v37 = vpop.eup %169 }
 0x1d5   :  { %v119_v38 = vpop.permute.xlu0 %118 }
 0x1d6   :  { %v122_v39 = vsel %vm121_vm1, %v170_v37, %v119_v38 }
 0x1d7   :  { %124 = vst.msk [vmem:[#allocation7] sm:$0x3] %vm123_vm2, %v122_v39 }
 0x1d8   :  { %226 = shalt.err (!%p223_p6)
}
 0x1d9   :  { %s227_s9 = scalar_lea.hbm %s304_s2, 32 }
 0x1da   :  { %p228_p7 = scmp.ne.s32.totalorder %s304_s2, %s227_s9  ;;  %p231_p8 = scmp.lt.u32.totalorder %s227_s9, %s304_s2 }
 0x1dc   :  { %p233_p9 = pnand %p231_p8, %p228_p7 }
 0x1de   :  { %236 = shalt.err (!%p233_p9)
}
 0x1df   :  { %134 = dma.vmem_to_hbm [thread:$0]  %s132_s5, 32, %s304_s2, [#allocation4]  }
 0x1e0   :  { %241 = dma.done.wait [#allocation4], 32  }
 0x1e1   :  { %242 = vsyncadd [#allocation4], 4294967264 }
 0x1e2   :  { %138 = vsyncpa [#allocation3], 1 }
 0x1e3   :  { %139 = vsyncpa [#allocation6], 1 }
 0x1e4   :  { %140 = vsyncpa [#allocation4], 1 }

</bundles_post_ra>
